<compile_context>
chip_gen: v6e
topology: v6e:2x2x1
jax: 0.10.0
libtpu: 0.0.40
codegen_flags: <defaults>
</compile_context>

<pallas_src>
import math

import numpy as np
import jax
import jax.numpy as jnp
from jax.experimental import pallas as pl
from jax.experimental.pallas import tpu as pltpu

_MIB = 1024 * 1024


# ----------------------------------------------------------------------------
# Plain-JAX glue (Hadamard matrix, padding, tile helpers)
# ----------------------------------------------------------------------------
def hadamard_matrix(n: int) -> jnp.ndarray:
    """Sylvester-ordered {+1,-1} Hadamard matrix (symmetric)."""
    assert n > 0 and (n & (n - 1)) == 0, "blocksize must be a power of 2"
    h = np.array([[1.0]], dtype=np.float32)
    while h.shape[0] < n:
        h = np.block([[h, h], [h, -h]])
    return jnp.asarray(h, dtype=jnp.float32)


def pad_to_block_last(x: jnp.ndarray, blocksize: int) -> jnp.ndarray:
    """JAX equivalent of pad_to_block(tensor, [-1], blocksize)."""
    size = x.shape[-1]
    delta = (-size) % blocksize
    if delta == 0:
        return x
    pads = [(0, 0)] * (x.ndim - 1) + [(0, delta)]
    return jnp.pad(x, pads)


def _round_up(v: int, m: int) -> int:
    return ((v + m - 1) // m) * m


def _vmem_capacity_bytes() -> int:
    """Per-TensorCore VMEM capacity; conservative v7x-sized fallback."""
    try:
        info = pltpu.get_tpu_info()
        for name in ("vmem_capacity_bytes", "vmem_bytes", "vmem_size_bytes"):
            cap = getattr(info, name, None)
            if cap:
                return int(cap)
    except Exception:
        pass
    return 64 * _MIB  # v7x per-TC VMEM; safe lower bound for v5e/v6e too


def _pick_tile(total: int, target: int, granule: int = 128) -> int:
    """Largest multiple of `granule` that divides `total` and is <= max(target, granule)."""
    assert total % granule == 0
    best = granule
    t = granule
    limit = min(max(target, granule), total)
    while t <= limit:
        if total % t == 0:
            best = t
        t += granule
    return best


# ----------------------------------------------------------------------------
# Pallas kernels: y = x @ w  with  x:(tm,tk), w:(tk,tn)  (weight pre-transposed)
# ----------------------------------------------------------------------------
def _matmul_acc_kernel(x_ref, w_ref, o_ref, acc_ref):
    # x_ref: (tm, tk), w_ref: (tk, tn), o_ref: (tm, tn), acc_ref: (tm, tn) f32
    @pl.when(pl.program_id(2) == 0)
    def _():
        acc_ref[...] = jnp.zeros_like(acc_ref)

    acc_ref[...] += jnp.dot(x_ref[...], w_ref[...],
                            preferred_element_type=jnp.float32)

    @pl.when(pl.program_id(2) == pl.num_programs(2) - 1)
    def _():
        o_ref[...] = acc_ref[...].astype(o_ref.dtype)


def _matmul_single_k_kernel(x_ref, w_ref, o_ref):
    # K fits in one tile: no accumulator, no pl.when, straight store.
    o_ref[...] = jnp.dot(x_ref[...], w_ref[...],
                         preferred_element_type=jnp.float32).astype(o_ref.dtype)


def _tiled_matmul(x2d, w_t, out_dtype, *, tm, tn, tk,
                  weight_buffers=2, vmem_limit_bytes=48 * _MIB):
    """x2d: (M, K), w_t: (K, N) -> (M, N) = x2d @ w_t."""
    M, K = x2d.shape
    Kw, N = w_t.shape
    assert K == Kw and M % tm == 0 and N % tn == 0 and K % tk == 0

    gm, gn, gk = M // tm, N // tn, K // tk

    w_index = lambda i, j, k: (k, j)
    if weight_buffers != 2:
        try:
            w_spec = pl.BlockSpec((tk, tn), w_index,
                                  pipeline_mode=pl.Buffered(weight_buffers))
        except TypeError:
            w_spec = pl.BlockSpec((tk, tn), w_index)
    else:
        w_spec = pl.BlockSpec((tk, tn), w_index)

    if gk == 1:
        kernel = _matmul_single_k_kernel
        scratch = []
    else:
        kernel = _matmul_acc_kernel
        scratch = [pltpu.VMEM((tm, tn), jnp.float32)]

    return pl.pallas_call(
        kernel,
        out_shape=jax.ShapeDtypeStruct((M, N), out_dtype),
        grid_spec=pltpu.PrefetchScalarGridSpec(
            num_scalar_prefetch=0,
            grid=(gm, gn, gk),
            in_specs=[
                pl.BlockSpec((tm, tk), lambda i, j, k: (i, k)),  # activations
                w_spec,                                          # weight (K, N)
            ],
            out_specs=pl.BlockSpec((tm, tn), lambda i, j, k: (i, j)),
            scratch_shapes=scratch,
        ),
        compiler_params=pltpu.CompilerParams(
            dimension_semantics=("parallel", "parallel", "arbitrary"),
            vmem_limit_bytes=vmem_limit_bytes,
        ),
    )(x2d, w_t)


# ----------------------------------------------------------------------------
# One-time weight prep (Hadamard fold + transpose + pad + cast)
# ----------------------------------------------------------------------------
def prepare_had_linear_weight(weight, *, blocksize, do_hadamard,
                              compute_dtype=jnp.bfloat16):
    """Fold block-diagonal Hadamard into W (exact for actquant==16), transpose to
    (in_dim, out_dim), pad to lane multiples, cast to compute dtype. Call ONCE."""
    out_dim, in_dim = weight.shape
    w32 = weight.astype(jnp.float32)
    if do_hadamard:
        assert in_dim % blocksize == 0, "weight in_dim must be a multiple of blocksize"
        h = hadamard_matrix(blocksize)
        wg = w32.reshape(out_dim, in_dim // blocksize, blocksize)
        # (x H_bd / sqrt(B)) @ (W / sqrt(B))^T == x @ ((W H_bd) / B)^T   (H symmetric)
        w32 = jnp.einsum("ngc,cb->ngb", wg, h).reshape(out_dim, in_dim) / blocksize
    w_t = w32.T  # (K, N): RHS contracted on sublane dim -> no per-tile XLU transpose
    Kp = _round_up(in_dim, 128)
    Np = _round_up(out_dim, 128)
    if (Kp, Np) != (in_dim, out_dim):
        w_t = jnp.pad(w_t, ((0, Kp - in_dim), (0, Np - out_dim)))
    return w_t.astype(compute_dtype)


# ----------------------------------------------------------------------------
# HadLinear module equivalent (weight prepped once, reused every forward)
# ----------------------------------------------------------------------------
class HadLinearPallas:
    def __init__(self, weight, blocksize, do_hadamard, actquant=16,
                 compute_dtype=jnp.bfloat16, tm=512, tn=1024, tk=1024):
        if actquant != 16:
            # TODO(synk): actquant != 16 needs the external boundaries/centroids
            # codebooks of quantize_hadamard (not part of the module) and would
            # invalidate the weight-side Hadamard fold.
            raise NotImplementedError("actquant != 16 not supported")
        self.blocksize = int(blocksize)
        self.do_hadamard = bool(do_hadamard)
        self.compute_dtype = compute_dtype
        self.out_dim, self.in_dim = weight.shape
        self.tm, self.tn, self.tk = tm, tn, tk
        self.w_t = prepare_had_linear_weight(
            weight, blocksize=blocksize, do_hadamard=do_hadamard,
            compute_dtype=compute_dtype)
        self.Kp, self.Np = self.w_t.shape
        # Generation-aware VMEM budget: v7x has 64 MiB/TC, v5e/v6e have 128 MiB.
        cap = _vmem_capacity_bytes()
        self.vmem_limit = int(min(max(cap - 16 * _MIB, 32 * _MIB), 100 * _MIB))

    def __call__(self, x):
        out_dtype = x.dtype
        if self.do_hadamard:
            x = pad_to_block_last(x, self.blocksize)
        assert x.shape[-1] == self.in_dim, "input feature dim must match weight in_dim"

        lead = x.shape[:-1]
        M = int(np.prod(lead)) if lead else 1
        x2d = x.reshape(M, self.in_dim).astype(self.compute_dtype)

        # ---- tile selection ------------------------------------------------
        in_bytes = jnp.dtype(self.compute_dtype).itemsize
        out_bytes = jnp.dtype(out_dtype).itemsize
        tm_ = min(self.tm, _round_up(M, 16))      # 16-row granule: dense bf16 packing
        tn_ = _pick_tile(self.Np, self.tn)        # lane-dense output stores
        tk_ = _pick_tile(self.Kp, self.tk)
        # Expose >= 2 iterations on a parallel axis so both v7x TensorCores get
        # work; on 1-TC chips this costs at most one extra ~0.35 us grid step.
        if M <= tm_ and self.Np // tn_ == 1 and self.Np % 256 == 0:
            tn_ = _pick_tile(self.Np, self.Np // 2)

        budget = self.vmem_limit - 8 * _MIB

        def footprint(tm_v, tn_v, tk_v, wbuf=2):
            return (2 * tm_v * tk_v * in_bytes            # double-buffered x tiles
                    + wbuf * tk_v * tn_v * in_bytes       # weight tiles
                    + 2 * tm_v * tn_v * out_bytes         # output tiles
                    + tm_v * tn_v * 4)                    # f32 accumulator

        for _ in range(16):
            if footprint(tm_, tn_, tk_) <= budget:
                break
            if tk_ >= tn_ and tk_ > 128:
                tk_ = _pick_tile(self.Kp, tk_ // 2)
            elif tn_ > 128:
                tn_ = _pick_tile(self.Np, tn_ // 2)
            elif tm_ > 16:
                tm_ = max(16, _round_up(tm_ // 2, 16))
            else:
                break

        Mp = _round_up(M, tm_)
        if (Mp, self.Kp) != x2d.shape:
            x2d = jnp.pad(x2d, ((0, Mp - M), (0, self.Kp - self.in_dim)))

        gn, gk = self.Np // tn_, self.Kp // tk_
        # Decode-sized M streaming many weight tiles: deepen the weight pipeline.
        deep = (tm_ <= 64) and (gn * gk >= 3) and (footprint(tm_, tn_, tk_, 3) <= budget)
        wbuf = 3 if deep else 2

        try:
            y2d = _tiled_matmul(x2d, self.w_t, out_dtype, tm=tm_, tn=tn_, tk=tk_,
                                weight_buffers=wbuf, vmem_limit_bytes=self.vmem_limit)
        except Exception:
            if wbuf == 2:
                raise
            y2d = _tiled_matmul(x2d, self.w_t, out_dtype, tm=tm_, tn=tn_, tk=tk_,
                                weight_buffers=2, vmem_limit_bytes=self.vmem_limit)

        return y2d[:M, :self.out_dim].reshape(lead + (self.out_dim,))


def had_linear_forward(x, weight, *, blocksize, do_hadamard, actquant=16,
                       compute_dtype=jnp.bfloat16):
    """One-off functional form. For repeated calls, build HadLinearPallas once."""
    layer = HadLinearPallas(weight, blocksize, do_hadamard, actquant,
                            compute_dtype=compute_dtype)
    return layer(x)


# ----------------------------------------------------------------------------
# Pure-JAX reference (mirrors the PyTorch forward exactly)
# ----------------------------------------------------------------------------
def had_linear_reference(x, weight, *, blocksize, do_hadamard):
    if do_hadamard:
        w = weight / math.sqrt(blocksize)
        x = pad_to_block_last(x, blocksize)
        mult = x.shape[-1] // blocksize
        xb = x.reshape(x.shape[:-1] + (mult, blocksize))
        h = hadamard_matrix(blocksize)
        xb = jnp.einsum("...gb,bc->...gc", xb, h) * (1.0 / math.sqrt(blocksize))
        x = xb.reshape(xb.shape[:-2] + (mult * blocksize,))
    else:
        w = weight
    return jnp.einsum("...k,nk->...n", x, w)


# ----------------------------------------------------------------------------
if __name__ == "__main__":
    key = jax.random.PRNGKey(0)
    kx, kw = jax.random.split(key)

    # Small shapes consistent with the module.
    batch, seq = 2, 8
    blocksize = 128          # Hadamard block (power of 2, lane-aligned)
    in_dim = 256             # multiple of blocksize (required by the torch module too)
    out_dim = 128

    x = jax.random.normal(kx, (batch, seq, in_dim), dtype=jnp.float32)
    weight = 0.02 * jax.random.normal(kw, (out_dim, in_dim), dtype=jnp.float32)
    y_ref = had_linear_reference(x, weight, blocksize=blocksize, do_hadamard=True)

    # do_hadamard=True, f32 compute (tight check of the Hadamard-fold math).
    layer_f32 = HadLinearPallas(weight, blocksize, do_hadamard=True,
                                compute_dtype=jnp.float32)
    y_f32 = jax.block_until_ready(layer_f32(x))
    np.testing.assert_allclose(np.asarray(y_f32), np.asarray(y_ref), rtol=1e-3, atol=1e-3)

    # do_hadamard=True, bf16 compute + f32 accumulation (production path);
    # weight prep happens once, forward reused across calls.
    layer_bf16 = HadLinearPallas(weight, blocksize, do_hadamard=True)
    y_bf16 = jax.block_until_ready(layer_bf16(x))
    np.testing.assert_allclose(np.asarray(y_bf16), np.asarray(y_ref), rtol=2e-2, atol=2e-2)
    y_bf16_again = jax.block_until_ready(layer_bf16(x))   # cached-weight reuse
    np.testing.assert_allclose(np.asarray(y_bf16_again), np.asarray(y_bf16), rtol=0, atol=0)

    # do_hadamard=False (plain linear; no identity matmul anywhere).
    layer_plain = HadLinearPallas(weight, blocksize, do_hadamard=False)
    y0 = jax.block_until_ready(layer_plain(x))
    y0_ref = had_linear_reference(x, weight, blocksize=blocksize, do_hadamard=False)
    np.testing.assert_allclose(np.asarray(y0), np.asarray(y0_ref), rtol=2e-2, atol=2e-2)

    print("KERNEL_OK")
</pallas_src>

<mosaic_0001>
module attributes {stable_mosaic.version = 11 : i64} {
  func.func @_matmul_single_k_kernel(%arg0: i32, %arg1: i32, %arg2: i32, %arg3: memref<16x256xf32, #tpu.memory_space<vmem>>, %arg4: memref<256x128xf32, #tpu.memory_space<vmem>>, %arg5: memref<16x128xf32, #tpu.memory_space<vmem>>) attributes {dimension_semantics = [#tpu.dimension_semantics<parallel>, #tpu.dimension_semantics<parallel>, #tpu.dimension_semantics<arbitrary>], iteration_bounds = array<i64: 1, 1, 1>, scalar_prefetch = 0 : i64, scratch_operands = 0 : i64, tpu.core_type = #tpu.core_type<tc>, window_params = [{transform_indices = @transform_0, window_bounds = array<i64: 16, 256>}, {transform_indices = @transform_1, window_bounds = array<i64: 256, 128>}, {transform_indices = @transform_2, window_bounds = array<i64: 16, 128>}]} {
    %c0 = arith.constant 0 : index
    %c0_0 = arith.constant 0 : index
    %0 = vector.load %arg3[%c0, %c0_0] : memref<16x256xf32, #tpu.memory_space<vmem>>, vector<16x256xf32>
    %c0_1 = arith.constant 0 : index
    %c0_2 = arith.constant 0 : index
    %1 = vector.load %arg4[%c0_1, %c0_2] : memref<256x128xf32, #tpu.memory_space<vmem>>, vector<256x128xf32>
    %cst = arith.constant dense<0.000000e+00> : vector<16x128xf32>
    %2 = tpu.matmul %0, %1, %cst {dimension_numbers = #tpu.dot_dimension_numbers<[1], [0], [0], [1], [0, 0, 1, 1], [], []>} : vector<16x256xf32>, vector<256x128xf32>, vector<16x128xf32> -> vector<16x128xf32>
    %c0_3 = arith.constant 0 : index
    %c0_4 = arith.constant 0 : index
    %3 = vector.load %arg5[%c0_3, %c0_4] : memref<16x128xf32, #tpu.memory_space<vmem>>, vector<16x128xf32>
    tpu.vector_store %arg5[%c0_3, %c0_4], %2 {strides = array<i32>} : memref<16x128xf32, #tpu.memory_space<vmem>>, vector<16x128xf32>,
    return
  }
  func.func @transform_0(%arg0: i32, %arg1: i32, %arg2: i32) -> (i32, i32) {
    %c0_i32 = arith.constant 0 : i32
    return %arg0, %arg2 : i32, i32
  }
  func.func @transform_1(%arg0: i32, %arg1: i32, %arg2: i32) -> (i32, i32) {
    %c0_i32 = arith.constant 0 : i32
    return %arg2, %arg1 : i32, i32
  }
  func.func @transform_2(%arg0: i32, %arg1: i32, %arg2: i32) -> (i32, i32) {
    %c0_i32 = arith.constant 0 : i32
    return %arg0, %arg1 : i32, i32
  }
}

</mosaic_0001>

<bundles_post_ra>
// kernel: tpu_custom_call.1
= control target key start
LH: loop header
LB: loop body
LE: loop exit
PB: predicated region body
PF: predicated region fallthrough
CT: control target
= control target key end

     0   :  { %7 = vsyncpa [#allocation3], 0  ;;  %s351_s0 = inlined_call_operand.hbm [shape: f32[16,256], index: 0, kind: input, shape index: {}]   ;;  %s352_s1 = inlined_call_operand.hbm [shape: f32[256,128], index: 1, kind: input, shape index: {}]   ;;  %s353_s2 = inlined_call_operand.hbm [shape: f32[16,128], index: 2, kind: output, shape index: {}]  }
   0x1   :  { %8 = vsyncpa [#allocation6], 0 }
   0x2   :  { %9 = vsyncpa [#allocation4], 0  ;;  %s314_s9 = smov [#allocation2]  }
   0x3   :  { %s15_s10 = sshll.u32 %s314_s9, 4  ;;  %s16_s10 = int_to_ptr.vmem [resolvable:$true] %s15_s10 }
   0x4   :  { %s256_s11 = scalar_lea.vmem %s16_s10, 512  ;;  %p261_p1 = scmp.lt.s32.totalorder %s16_s10, %s16_s10 }
   0x5   :  { %p257_p0 = scmp.ne.s32.totalorder %s16_s10, %s256_s11  ;;  %p262_p2 = scmp.lt.s32.totalorder %s256_s11, %s256_s11 }
   0x7   :  { %p263_p3 = por %p262_p2, %p261_p1 }
   0x9   :  { %p264_p4 = pnand %p263_p3, %p257_p0 }
   0xb   :  { %267 = shalt.err (!%p264_p4)
}
   0xc   :  { %s315_s12 = smov 256   ;;  %s316_s13 = smov 16  }
   0xd   :  { %21 = dma.hbm_to_vmem [thread:$0]  %s351_s0, 512, %s16_s10, [#allocation3], %s315_s12, %s315_s12, %s316_s13  }
   0xe   :  { %s317_s16 = smov [#allocation5]  }
   0xf   :  { %s27_s17 = sshll.u32 %s317_s16, 4  ;;  %s28_s17 = int_to_ptr.vmem [resolvable:$true] %s27_s17 }
  0x10   :  { %s276_s18 = scalar_lea.vmem %s28_s17, 4096  ;;  %p281_p6 = scmp.lt.s32.totalorder %s28_s17, %s28_s17 }
  0x11   :  { %p277_p5 = scmp.ne.s32.totalorder %s28_s17, %s276_s18  ;;  %p282_p7 = scmp.lt.s32.totalorder %s276_s18, %s276_s18 }
  0x13   :  { %p283_p8 = por %p282_p7, %p281_p6 }
  0x15   :  { %p284_p9 = pnand %p283_p8, %p277_p5 }
  0x17   :  { %287 = shalt.err (!%p284_p9)
}
  0x18   :  { %s318_s19 = smov 128   ;;  %s319_s20 = smov 8  }
  0x19   :  { %33 = dma.hbm_to_vmem [thread:$0]  %s352_s1, 4096, %s28_s17, [#allocation6], %s318_s19, %s318_s19, %s319_s20  }
  0x1a   :  { %308 = dma.done.wait [#allocation3], 512  }
  0x1b   :  { %309 = vsyncadd [#allocation3], 4294966784 }
  0x1c   :  { %310 = dma.done.wait [#allocation6], 4096  }
  0x1d   :  { %311 = vsyncadd [#allocation6], 4294963200  ;;  %v75_v0 = vld [vmem:[#allocation5 + $0xf8] sm:$0xff]  ;;  %v74_v2 = vld [vmem:[#allocation5 + $0xf0] sm:$0xff]  ;;  %s320_s0 = smov [#allocation7]  }
  0x1e   :  { %v59_v1 = vld [vmem:[#allocation5 + $0x78] sm:$0xff]  ;;  %171 = vmatprep.subr.mxu0 %v75_v0  ;;  %209 = vmatprep.subr.mxu1 %v75_v0  ;;  %v58_v3 = vld [vmem:[#allocation5 + $0x70] sm:$0xff]  ;;  %v73_v4 = vld [vmem:[#allocation5 + $0xe8] sm:$0xff]  ;;  %s158_s1 = sshll.u32 %s320_s0, 4  ;;  %s159_s1 = int_to_ptr.vmem [resolvable:$true] %s158_s1 }
  0x1f   :  { %172 = vmatpush3.msra.mxu0 %v59_v1  ;;  %225 = vmatpush3.msra.mxu1 %v59_v1  ;;  %v57_v5 = vld [vmem:[#allocation5 + $0x68] sm:$0xff]  ;;  %v72_v6 = vld [vmem:[#allocation5 + $0xe0] sm:$0xff]  ;;  %v71_v8 = vld [vmem:[#allocation5 + $0xd8] sm:$0xff]  ;;  %s288_s23 = scalar_lea.vmem %s159_s1, 256  ;;  %p293_p11 = scmp.lt.s32.totalorder %s159_s1, %s159_s1 }
  0x20   :  { %173 = vmatprep.subr.mxu0 %v74_v2  ;;  %210 = vmatprep.subr.mxu1 %v74_v2  ;;  %v56_v7 = vld [vmem:[#allocation5 + $0x60] sm:$0xff]  ;;  %v55_v9 = vld [vmem:[#allocation5 + $0x58] sm:$0xff]  ;;  %v70_v10 = vld [vmem:[#allocation5 + $0xd0] sm:$0xff]  ;;  %p289_p10 = scmp.ne.s32.totalorder %s159_s1, %s288_s23  ;;  %p294_p12 = scmp.lt.s32.totalorder %s288_s23, %s288_s23 }
  0x21   :  { %174 = vmatpush3.msra.mxu0 %v58_v3  ;;  %226 = vmatpush3.msra.mxu1 %v58_v3  ;;  %v54_v11 = vld [vmem:[#allocation5 + $0x50] sm:$0xff]  ;;  %v69_v12 = vld [vmem:[#allocation5 + $0xc8] sm:$0xff]  ;;  %v68_v14 = vld [vmem:[#allocation5 + $0xc0] sm:$0xff] }
  0x22   :  { %175 = vmatprep.subr.mxu0 %v73_v4  ;;  %211 = vmatprep.subr.mxu1 %v73_v4  ;;  %v53_v13 = vld [vmem:[#allocation5 + $0x48] sm:$0xff]  ;;  %v52_v15 = vld [vmem:[#allocation5 + $0x40] sm:$0xff]  ;;  %v67_v16 = vld [vmem:[#allocation5 + $0xb8] sm:$0xff]  ;;  %p295_p13 = por %p294_p12, %p293_p11 }
  0x23   :  { %176 = vmatpush3.msra.mxu0 %v57_v5  ;;  %227 = vmatpush3.msra.mxu1 %v57_v5  ;;  %v51_v17 = vld [vmem:[#allocation5 + $0x38] sm:$0xff]  ;;  %v66_v18 = vld [vmem:[#allocation5 + $0xb0] sm:$0xff]  ;;  %v65_v20 = vld [vmem:[#allocation5 + $0xa8] sm:$0xff] }
  0x24   :  { %177 = vmatprep.subr.mxu0 %v72_v6  ;;  %212 = vmatprep.subr.mxu1 %v72_v6  ;;  %v50_v19 = vld [vmem:[#allocation5 + $0x30] sm:$0xff]  ;;  %v49_v21 = vld [vmem:[#allocation5 + $0x28] sm:$0xff]  ;;  %v64_v22 = vld [vmem:[#allocation5 + $0xa0] sm:$0xff]  ;;  %p296_p0 = pnand %p295_p13, %p289_p10 }
  0x25   :  { %178 = vmatpush3.msra.mxu0 %v56_v7  ;;  %228 = vmatpush3.msra.mxu1 %v56_v7  ;;  %v48_v23 = vld [vmem:[#allocation5 + $0x20] sm:$0xff]  ;;  %v63_v24 = vld [vmem:[#allocation5 + $0x98] sm:$0xff]  ;;  %v62_v26 = vld [vmem:[#allocation5 + $0x90] sm:$0xff] }
  0x26   :  { %179 = vmatprep.subr.mxu0 %v71_v8  ;;  %213 = vmatprep.subr.mxu1 %v71_v8  ;;  %v47_v25 = vld [vmem:[#allocation5 + $0x18] sm:$0xff]  ;;  %v46_v27 = vld [vmem:[#allocation5 + $0x10] sm:$0xff]  ;;  %v61_v28 = vld [vmem:[#allocation5 + $0x88] sm:$0xff] }
  0x27   :  { %180 = vmatpush3.msra.mxu0 %v55_v9  ;;  %229 = vmatpush3.msra.mxu1 %v55_v9  ;;  %v45_v29 = vld [vmem:[#allocation5 + $0x8] sm:$0xff]  ;;  %v60_v30 = vld [vmem:[#allocation5 + $0x80] sm:$0xff]  ;;  %v43_v33 = vld [vmem:[#allocation2 + $0x18] sm:$0xff] }
  0x28   :  { %181 = vmatprep.subr.mxu0 %v70_v10  ;;  %214 = vmatprep.subr.mxu1 %v70_v10  ;;  %v44_v31 = vld [vmem:[#allocation5] sm:$0xff]  ;;  %v41_v32 = vld [vmem:[#allocation2 + $0x8] sm:$0xff]  ;;  %v42_v35 = vld [vmem:[#allocation2 + $0x10] sm:$0xff] }
  0x29   :  { %182 = vmatpush3.msra.mxu0 %v54_v11  ;;  %230 = vmatpush3.msra.mxu1 %v54_v11  ;;  %v40_v34 = vld [vmem:[#allocation2] sm:$0xff] }
  0x2a   :  { %183 = vmatprep.subr.mxu0 %v69_v12  ;;  %215 = vmatprep.subr.mxu1 %v69_v12 }
  0x2b   :  { %184 = vmatpush3.msra.mxu0 %v53_v13  ;;  %231 = vmatpush3.msra.mxu1 %v53_v13 }
  0x2c   :  { %185 = vmatprep.subr.mxu0 %v68_v14  ;;  %216 = vmatprep.subr.mxu1 %v68_v14 }
  0x2d   :  { %186 = vmatpush3.msra.mxu0 %v52_v15  ;;  %232 = vmatpush3.msra.mxu1 %v52_v15 }
  0x2e   :  { %187 = vmatprep.subr.mxu0 %v67_v16  ;;  %217 = vmatprep.subr.mxu1 %v67_v16 }
  0x2f   :  { %188 = vmatpush3.msra.mxu0 %v51_v17  ;;  %233 = vmatpush3.msra.mxu1 %v51_v17 }
  0x30   :  { %189 = vmatprep.subr.mxu0 %v66_v18  ;;  %218 = vmatprep.subr.mxu1 %v66_v18 }
  0x31   :  { %190 = vmatpush3.msra.mxu0 %v50_v19  ;;  %234 = vmatpush3.msra.mxu1 %v50_v19 }
  0x32   :  { %191 = vmatprep.subr.mxu0 %v65_v20  ;;  %219 = vmatprep.subr.mxu1 %v65_v20 }
  0x33   :  { %192 = vmatpush3.msra.mxu0 %v49_v21  ;;  %235 = vmatpush3.msra.mxu1 %v49_v21 }
  0x34   :  { %193 = vmatprep.subr.mxu0 %v64_v22  ;;  %220 = vmatprep.subr.mxu1 %v64_v22 }
  0x35   :  { %194 = vmatpush3.msra.mxu0 %v48_v23  ;;  %236 = vmatpush3.msra.mxu1 %v48_v23 }
  0x36   :  { %195 = vmatprep.subr.mxu0 %v63_v24  ;;  %221 = vmatprep.subr.mxu1 %v63_v24 }
  0x37   :  { %196 = vmatpush3.msra.mxu0 %v47_v25  ;;  %237 = vmatpush3.msra.mxu1 %v47_v25 }
  0x38   :  { %197 = vmatprep.subr.mxu0 %v62_v26  ;;  %222 = vmatprep.subr.mxu1 %v62_v26 }
  0x39   :  { %198 = vmatpush3.msra.mxu0 %v46_v27  ;;  %238 = vmatpush3.msra.mxu1 %v46_v27 }
  0x3a   :  { %199 = vmatprep.subr.mxu0 %v61_v28  ;;  %223 = vmatprep.subr.mxu1 %v61_v28 }
  0x3b   :  { %200 = vmatpush3.msra.mxu0 %v45_v29  ;;  %239 = vmatpush3.msra.mxu1 %v45_v29 }
  0x3c   :  { %201 = vmatprep.subr.mxu0 %v60_v30  ;;  %224 = vmatprep.subr.mxu1 %v60_v30 }
  0x3d   :  { %202 = vmatpush3.msra.mxu0 %v44_v31  ;;  %240 = vmatpush3.msra.mxu1 %v44_v31 }
  0x3e   :  { %140 = vmatprep.mubr.f32.mxu0 %v41_v32  ;;  %145 = vmatprep.mubr.f32.mxu1 %v43_v33 }
  0x3f   :  { %141 = vmatmul.mubr.f32.vlgmr.msra.gmra.mxu0 %v40_v34  ;;  %146 = vmatmul.mubr.f32.vlgmr.msra.gmra.mxu1 %v42_v35 }
  0xff   :  { %v203_v36 = vpop.f32.mrf.mxu0  ;;  %v206_v37 = vpop.f32.mrf.mxu1 }
 0x101   :  { %v204_v38 = vpop.f32.mrf.mxu0  ;;  %v207_v39 = vpop.f32.mrf.mxu1 }
 0x102   :  { %v205_v40 = vadd.f32 %v204_v38, %v203_v36  ;;  %v208_v41 = vadd.f32 %v207_v39, %v206_v37 }
 0x104   :  { %151 = vst [vmem:[#allocation7] sm:$0xff] %v205_v40  ;;  %152 = vst [vmem:[#allocation7 + $0x8] sm:$0xff] %v208_v41 }
 0x105   :  { %299 = shalt.err (!%p296_p0)
}
 0x106   :  { %164 = dma.vmem_to_hbm [thread:$0]  %s159_s1, 256, %s353_s2, [#allocation4], %s318_s19, %s318_s19, %s319_s20  }
 0x107   :  { %312 = dma.done.wait [#allocation4], 256  }
 0x108   :  { %313 = vsyncadd [#allocation4], 4294967040 }
 0x109   :  { %168 = vsyncpa [#allocation3], 1 }
 0x10a   :  { %169 = vsyncpa [#allocation6], 1 }
 0x10b   :  { %170 = vsyncpa [#allocation4], 1 }

</bundles_post_ra>
